<compile_context>
chip_gen: v5e
topology: v5e:2x2
jax: 0.10.0
libtpu: 0.0.40
codegen_flags: <defaults>
</compile_context>

<pallas_src>
import jax
import jax.numpy as jnp
from jax.experimental import pallas as pl
from jax.experimental.pallas import tpu as pltpu

_BN_EPS = 1e-5
_VMEM_LIMIT_BYTES = 48 * 1024 * 1024       # scoped VMEM limit; safe on v7x (64 MiB physical)
_FUSED_VMEM_BUDGET = 32 * 1024 * 1024      # budget for resident y + x tiles (fused path)
_STREAM_TILE_BUDGET = 24 * 1024 * 1024     # budget for double-buffered x/out tiles (two-pass)


def _round_up(x, m):
    return ((x + m - 1) // m) * m


def _largest_tile(hwp, cap):
    """Largest multiple-of-128 divisor of hwp that is <= cap (hwp % 128 == 0)."""
    cap = max(128, min(int(cap), hwp))
    best = 128
    for cand in range(128, cap + 1, 128):
        if hwp % cand == 0:
            best = cand
    return best


def _largest_divisor_leq(n, cap):
    for d in range(min(n, cap), 0, -1):
        if n % d == 0:
            return d
    return 1


# ---------------------------------------------------------------------------
# Fused path: conv (1x1) + training-mode BN + ReLU in a single pallas_call.
# Output block is resident in VMEM for the entire grid.
# ---------------------------------------------------------------------------
def _make_fused_kernel(ts, m_total, eps):
    inv_m = 1.0 / float(m_total)

    def kernel(x_ref, w_ref, gamma_ref, beta_ref, o_ref, sum_sc, sq_sc):
        # x_ref:     (Bblk, Cin, TS)     one batch block, one spatial tile
        # w_ref:     (Cout, Cin)         resident 1x1 conv weight
        # gamma_ref: (Cout, 1)           BN gamma
        # beta_ref:  (Cout, 1)           BN beta
        # o_ref:     (N, Cout, HWp)      resident output (constant index_map)
        # sum_sc/sq_sc: (Cout, 1) f32    per-channel accumulators
        nb = pl.program_id(0)
        s = pl.program_id(1)
        first = jnp.logical_and(nb == 0, s == 0)
        last = jnp.logical_and(nb == pl.num_programs(0) - 1,
                               s == pl.num_programs(1) - 1)

        @pl.when(first)
        def _():
            sum_sc[...] = jnp.zeros_like(sum_sc)
            sq_sc[...] = jnp.zeros_like(sq_sc)

        b_blk = x_ref.shape[0]
        cout = w_ref.shape[0]
        col = pl.multiple_of(s * ts, 128)
        row0 = nb * b_blk

        w = w_ref[...]
        part_sum = jnp.zeros((cout, 1), jnp.float32)
        part_sq = jnp.zeros((cout, 1), jnp.float32)
        for b in range(b_blk):  # small static unroll (b_blk <= 8)
            y = jnp.dot(w, x_ref[b], preferred_element_type=jnp.float32)  # (Cout, TS)
            part_sum = part_sum + jnp.sum(y, axis=1, keepdims=True)
            part_sq = part_sq + jnp.sum(y * y, axis=1, keepdims=True)
            o_ref[pl.ds(row0 + b, 1), :, pl.ds(col, ts)] = y[None].astype(o_ref.dtype)

        sum_sc[...] += part_sum
        sq_sc[...] += part_sq

        @pl.when(last)
        def _():
            mean = sum_sc[...] * inv_m                                   # (Cout, 1)
            var = jnp.maximum(sq_sc[...] * inv_m - mean * mean, 0.0)
            scale = gamma_ref[...] * jax.lax.rsqrt(var + eps)            # (Cout, 1)
            shift = beta_ref[...] - mean * scale

            @pl.loop(0, o_ref.shape[0])
            def _(i):
                yb = o_ref[pl.ds(i, 1)].astype(jnp.float32)              # (1, Cout, HWp)
                o_ref[pl.ds(i, 1)] = jnp.maximum(
                    yb * scale + shift, 0.0).astype(o_ref.dtype)

    return kernel


# ---------------------------------------------------------------------------
# Two-pass streaming fallback (large N*HW): per-batch partial stats (megacore
# parallel on the batch axis), then apply folded BN FMA + ReLU.
# ---------------------------------------------------------------------------
def _stats_kernel(x_ref, w_ref, sum_ref, sq_ref):
    # x_ref: (1, Cin, TS); w_ref: (Cout, Cin)
    # sum_ref/sq_ref: (1, Cout, 1) per-batch partial accumulators
    @pl.when(pl.program_id(1) == 0)
    def _():
        sum_ref[...] = jnp.zeros_like(sum_ref)
        sq_ref[...] = jnp.zeros_like(sq_ref)

    y = jnp.dot(w_ref[...], x_ref[0], preferred_element_type=jnp.float32)  # (Cout, TS)
    sum_ref[0] += jnp.sum(y, axis=1, keepdims=True)
    sq_ref[0] += jnp.sum(y * y, axis=1, keepdims=True)


def _apply_kernel(x_ref, w_ref, scale_ref, shift_ref, o_ref):
    # x_ref: (1, Cin, TS); w_ref: (Cout, Cin); scale/shift: (Cout, 1); o_ref: (1, Cout, TS)
    y = jnp.dot(w_ref[...], x_ref[0], preferred_element_type=jnp.float32)
    out = y * scale_ref[...] + shift_ref[...]
    o_ref[0] = jnp.maximum(out, 0.0).astype(o_ref.dtype)


# ---------------------------------------------------------------------------
# Wrapper
# ---------------------------------------------------------------------------
def unet_grid_gating_signal2(x_nchw, w_conv, b_conv, bn_gamma, bn_beta,
                             force_two_pass=False):
    """Forward of UnetGridGatingSignal2 (is_batchnorm=True, training-mode BN).

    x_nchw: (N, Cin, H, W); w_conv: (Cout, Cin, 1, 1); b_conv/bn_gamma/bn_beta: (Cout,)
    Returns (N, Cout, H, W).
    """
    # TODO(synk): eval-mode BN (running stats) not implemented; in training-mode
    # BN the conv bias cancels exactly under mean subtraction, so it is dropped.
    del b_conv
    N, Cin, H, W = x_nchw.shape
    Cout = w_conv.shape[0]
    HW = H * W
    HWp = _round_up(HW, 128)
    M = N * HW                      # true element count for BN statistics

    x3 = x_nchw.reshape(N, Cin, HW)
    if HWp != HW:
        # Zero padding contributes 0 to sum/sumsq (W @ 0 = 0); divisor stays M.
        x3 = jnp.pad(x3, ((0, 0), (0, 0), (0, HWp - HW)))
    w2d = w_conv.reshape(Cout, Cin)
    gamma2 = bn_gamma.reshape(Cout, 1).astype(jnp.float32)
    beta2 = bn_beta.reshape(Cout, 1).astype(jnp.float32)

    itemsize = 4
    out_bytes = 2 * N * Cout * HWp * itemsize          # resident output (x2 safety)
    w_bytes = 2 * Cout * Cin * itemsize

    use_fused = False
    if not force_two_pass:
        min_x_tile = 2 * Cin * 128 * itemsize
        if out_bytes + w_bytes + min_x_tile <= _FUSED_VMEM_BUDGET:
            b_blk = _largest_divisor_leq(N, 8)
            rem = _FUSED_VMEM_BUDGET - out_bytes - w_bytes
            cap = rem // (2 * b_blk * Cin * itemsize)
            if cap >= 128:
                ts = _largest_tile(HWp, cap)
                use_fused = True

    if use_fused:
        n_s = HWp // ts
        kernel = _make_fused_kernel(ts=ts, m_total=M, eps=_BN_EPS)
        out3 = pl.pallas_call(
            kernel,
            out_shape=jax.ShapeDtypeStruct((N, Cout, HWp), x_nchw.dtype),
            grid=(N // b_blk, n_s),
            in_specs=[
                pl.BlockSpec((b_blk, Cin, ts), lambda n, s: (n, 0, s)),
                pl.BlockSpec((Cout, Cin), lambda n, s: (0, 0)),
                pl.BlockSpec((Cout, 1), lambda n, s: (0, 0)),
                pl.BlockSpec((Cout, 1), lambda n, s: (0, 0)),
            ],
            out_specs=pl.BlockSpec((N, Cout, HWp), lambda n, s: (0, 0, 0)),
            scratch_shapes=[pltpu.VMEM((Cout, 1), jnp.float32),
                            pltpu.VMEM((Cout, 1), jnp.float32)],
            compiler_params=pltpu.CompilerParams(
                dimension_semantics=("arbitrary", "arbitrary"),
                vmem_limit_bytes=_VMEM_LIMIT_BYTES),
        )(x3, w2d, gamma2, beta2)
    else:
        # ---- pass 1: per-batch partial stats (batch axis megacore-parallel) ----
        cap = _STREAM_TILE_BUDGET // (2 * (Cin + Cout) * itemsize)
        ts = _largest_tile(HWp, cap)
        n_s = HWp // ts

        psums, psqs = pl.pallas_call(
            _stats_kernel,
            out_shape=(jax.ShapeDtypeStruct((N, Cout, 1), jnp.float32),
                       jax.ShapeDtypeStruct((N, Cout, 1), jnp.float32)),
            grid=(N, n_s),
            in_specs=[
                pl.BlockSpec((1, Cin, ts), lambda n, s: (n, 0, s)),
                pl.BlockSpec((Cout, Cin), lambda n, s: (0, 0)),
            ],
            out_specs=(pl.BlockSpec((1, Cout, 1), lambda n, s: (n, 0, 0)),
                       pl.BlockSpec((1, Cout, 1), lambda n, s: (n, 0, 0))),
            compiler_params=pltpu.CompilerParams(
                dimension_semantics=("parallel", "arbitrary"),
                vmem_limit_bytes=_VMEM_LIMIT_BYTES),
        )(x3, w2d)

        sums = jnp.sum(psums[:, :, 0], axis=0)
        sqs = jnp.sum(psqs[:, :, 0], axis=0)
        mean = sums / M
        var = jnp.maximum(sqs / M - mean * mean, 0.0)   # biased var (PyTorch BN fwd)
        scale = bn_gamma.astype(jnp.float32) * jax.lax.rsqrt(var + _BN_EPS)
        shift = bn_beta.astype(jnp.float32) - mean * scale
        scale2 = scale.reshape(Cout, 1)
        shift2 = shift.reshape(Cout, 1)

        # ---- pass 2: conv + folded BN FMA + ReLU, fully parallel grid ----------
        out3 = pl.pallas_call(
            _apply_kernel,
            out_shape=jax.ShapeDtypeStruct((N, Cout, HWp), x_nchw.dtype),
            grid=(N, n_s),
            in_specs=[
                pl.BlockSpec((1, Cin, ts), lambda n, s: (n, 0, s)),
                pl.BlockSpec((Cout, Cin), lambda n, s: (0, 0)),
                pl.BlockSpec((Cout, 1), lambda n, s: (0, 0)),
                pl.BlockSpec((Cout, 1), lambda n, s: (0, 0)),
            ],
            out_specs=pl.BlockSpec((1, Cout, ts), lambda n, s: (n, 0, s)),
            compiler_params=pltpu.CompilerParams(
                dimension_semantics=("parallel", "parallel"),
                vmem_limit_bytes=_VMEM_LIMIT_BYTES),
        )(x3, w2d, scale2, shift2)

    if HWp != HW:
        out3 = out3[:, :, :HW]
    return out3.reshape(N, Cout, H, W)


def _reference(x_nchw, w_conv, b_conv, bn_gamma, bn_beta):
    """Pure-JAX reference of the same forward (for a sanity check)."""
    N, Cin, H, W = x_nchw.shape
    Cout = w_conv.shape[0]
    x2d = jnp.transpose(x_nchw, (0, 2, 3, 1)).reshape(-1, Cin)
    y = x2d @ w_conv.reshape(Cout, Cin).T + b_conv[None, :]
    mean = jnp.mean(y, axis=0, keepdims=True)
    var = jnp.mean((y - mean) ** 2, axis=0, keepdims=True)
    y = (y - mean) / jnp.sqrt(var + _BN_EPS)
    y = bn_gamma[None, :] * y + bn_beta[None, :]
    y = jnp.maximum(y, 0.0)
    return jnp.transpose(y.reshape(N, H, W, Cout), (0, 3, 1, 2))


if __name__ == "__main__":
    key = jax.random.PRNGKey(0)
    k_x, k_w, k_b, k_g, k_x2 = jax.random.split(key, 5)

    # Small shapes consistent with the module: in_size=4, out_size=8, 16x16 spatial.
    N, Cin, Cout, H, W = 2, 4, 8, 16, 16

    x = jax.random.normal(k_x, (N, Cin, H, W), dtype=jnp.float32)

    # Deterministic parameter init mimicking the module's __init__ (kaiming fan_in
    # for the conv; BN weight ~ N(1, 0.02), BN bias = 0).
    fan_in = Cin * 1 * 1
    w_conv = jax.random.normal(k_w, (Cout, Cin, 1, 1), dtype=jnp.float32) * jnp.sqrt(2.0 / fan_in)
    b_conv = jax.random.normal(k_b, (Cout,), dtype=jnp.float32) * 0.01
    bn_gamma = 1.0 + 0.02 * jax.random.normal(k_g, (Cout,), dtype=jnp.float32)
    bn_beta = jnp.zeros((Cout,), dtype=jnp.float32)

    # Case 1: fused single-pass path (HW is a multiple of 128).
    out = jax.block_until_ready(unet_grid_gating_signal2(x, w_conv, b_conv, bn_gamma, bn_beta))
    ref = _reference(x, w_conv, b_conv, bn_gamma, bn_beta)
    assert out.shape == (N, Cout, H, W)
    assert jnp.allclose(out, ref, atol=1e-4, rtol=1e-4), float(jnp.max(jnp.abs(out - ref)))

    # Case 2: non-128-multiple spatial size (zero-padded lanes) via the fused path.
    N2, H2, W2 = 3, 10, 10
    x2 = jax.random.normal(k_x2, (N2, Cin, H2, W2), dtype=jnp.float32)
    out2 = jax.block_until_ready(unet_grid_gating_signal2(x2, w_conv, b_conv, bn_gamma, bn_beta))
    ref2 = _reference(x2, w_conv, b_conv, bn_gamma, bn_beta)
    assert out2.shape == (N2, Cout, H2, W2)
    assert jnp.allclose(out2, ref2, atol=1e-4, rtol=1e-4), float(jnp.max(jnp.abs(out2 - ref2)))

    # Case 3: force the two-pass streaming fallback (per-batch partial stats).
    out3 = jax.block_until_ready(
        unet_grid_gating_signal2(x, w_conv, b_conv, bn_gamma, bn_beta, force_two_pass=True))
    assert jnp.allclose(out3, ref, atol=1e-4, rtol=1e-4), float(jnp.max(jnp.abs(out3 - ref)))

    print("KERNEL_OK")
</pallas_src>

<mosaic_0001>
module attributes {stable_mosaic.version = 11 : i64} {
  func.func @kernel(%arg0: i32, %arg1: i32, %arg2: memref<2x4x256xf32, #tpu.memory_space<vmem>>, %arg3: memref<8x4xf32, #tpu.memory_space<vmem>>, %arg4: memref<8x1xf32, #tpu.memory_space<vmem>>, %arg5: memref<8x1xf32, #tpu.memory_space<vmem>>, %arg6: memref<2x8x256xf32, #tpu.memory_space<vmem>>, %arg7: memref<8x1xf32, #tpu.memory_space<vmem>>, %arg8: memref<8x1xf32, #tpu.memory_space<vmem>>) attributes {dimension_semantics = [#tpu.dimension_semantics<arbitrary>, #tpu.dimension_semantics<arbitrary>], iteration_bounds = array<i64: 1, 1>, scalar_prefetch = 0 : i64, scratch_operands = 2 : i64, tpu.core_type = #tpu.core_type<tc>, window_params = [{transform_indices = @transform_0, window_bounds = array<i64: 2, 4, 256>}, {pipeline_mode = #tpu.pipeline_mode<synchronous>, transform_indices = @transform_1, window_bounds = array<i64: 8, 4>}, {pipeline_mode = #tpu.pipeline_mode<synchronous>, transform_indices = @transform_2, window_bounds = array<i64: 8, 1>}, {pipeline_mode = #tpu.pipeline_mode<synchronous>, transform_indices = @transform_3, window_bounds = array<i64: 8, 1>}, {pipeline_mode = #tpu.pipeline_mode<synchronous>, transform_indices = @transform_4, window_bounds = array<i64: 2, 8, 256>}]} {
    %c0_i32 = arith.constant 0 : i32
    %0 = arith.cmpi eq, %arg0, %c0_i32 : i32
    %c0_i32_0 = arith.constant 0 : i32
    %1 = arith.cmpi eq, %arg1, %c0_i32_0 : i32
    %2 = arith.andi %0, %1 : i1
    %c0_i32_1 = arith.constant 0 : i32
    %3 = arith.cmpi eq, %arg0, %c0_i32_1 : i32
    %c0_i32_2 = arith.constant 0 : i32
    %4 = arith.cmpi eq, %arg1, %c0_i32_2 : i32
    %5 = arith.andi %3, %4 : i1
    %6 = arith.extui %2 : i1 to i32
    %c0_i32_3 = arith.constant 0 : i32
    %7 = arith.cmpi ne, %6, %c0_i32_3 : i32
    scf.if %7 {
      %cst_29 = arith.constant 0.000000e+00 : f32
      %52 = vector.broadcast %cst_29 : f32 to vector<8x1xf32>
      %c0_30 = arith.constant 0 : index
      %c0_31 = arith.constant 0 : index
      %53 = vector.load %arg7[%c0_30, %c0_31] : memref<8x1xf32, #tpu.memory_space<vmem>>, vector<8x1xf32>
      tpu.vector_store %arg7[%c0_30, %c0_31], %52 {strides = array<i32>} : memref<8x1xf32, #tpu.memory_space<vmem>>, vector<8x1xf32>,
      %cst_32 = arith.constant 0.000000e+00 : f32
      %54 = vector.broadcast %cst_32 : f32 to vector<8x1xf32>
      %c0_33 = arith.constant 0 : index
      %c0_34 = arith.constant 0 : index
      %55 = vector.load %arg8[%c0_33, %c0_34] : memref<8x1xf32, #tpu.memory_space<vmem>>, vector<8x1xf32>
      tpu.vector_store %arg8[%c0_33, %c0_34], %54 {strides = array<i32>} : memref<8x1xf32, #tpu.memory_space<vmem>>, vector<8x1xf32>,
    } else {
    }
    %c256_i32 = arith.constant 256 : i32
    %8 = arith.muli %arg1, %c256_i32 : i32
    %9 = tpu.assume_multiple %8, 128 : i32
    %c2_i32 = arith.constant 2 : i32
    %10 = arith.muli %arg0, %c2_i32 : i32
    %c0 = arith.constant 0 : index
    %c0_4 = arith.constant 0 : index
    %11 = vector.load %arg3[%c0, %c0_4] : memref<8x4xf32, #tpu.memory_space<vmem>>, vector<8x4xf32>
    %cst = arith.constant 0.000000e+00 : f32
    %12 = vector.broadcast %cst : f32 to vector<8x1xf32>
    %cst_5 = arith.constant 0.000000e+00 : f32
    %13 = vector.broadcast %cst_5 : f32 to vector<8x1xf32>
    %c0_6 = arith.constant 0 : index
    %c0_7 = arith.constant 0 : index
    %c0_8 = arith.constant 0 : index
    %14 = vector.load %arg2[%c0_6, %c0_7, %c0_8] : memref<2x4x256xf32, #tpu.memory_space<vmem>>, vector<1x4x256xf32>
    %15 = vector.shape_cast %14 : vector<1x4x256xf32> to vector<4x256xf32>
    %cst_9 = arith.constant dense<0.000000e+00> : vector<8x256xf32>
    %16 = tpu.matmul %11, %15, %cst_9 {dimension_numbers = #tpu.dot_dimension_numbers<[1], [0], [0], [1], [0, 0, 1, 1], [], []>} : vector<8x4xf32>, vector<4x256xf32>, vector<8x256xf32> -> vector<8x256xf32>
    %cst_10 = arith.constant dense<0.000000e+00> : vector<8xf32>
    %17 = vector.multi_reduction <add>, %16, %cst_10 [1] : vector<8x256xf32> to vector<8xf32>
    %18 = vector.shape_cast %17 : vector<8xf32> to vector<8x1xf32>
    %19 = arith.addf %12, %18 : vector<8x1xf32>
    %20 = arith.mulf %16, %16 : vector<8x256xf32>
    %cst_11 = arith.constant dense<0.000000e+00> : vector<8xf32>
    %21 = vector.multi_reduction <add>, %20, %cst_11 [1] : vector<8x256xf32> to vector<8xf32>
    %22 = vector.shape_cast %21 : vector<8xf32> to vector<8x1xf32>
    %23 = arith.addf %13, %22 : vector<8x1xf32>
    %24 = vector.shape_cast %16 : vector<8x256xf32> to vector<1x8x256xf32>
    %c0_i32_12 = arith.constant 0 : i32
    %25 = arith.addi %10, %c0_i32_12 : i32
    %26 = arith.index_cast %25 : i32 to index
    %c0_13 = arith.constant 0 : index
    %27 = arith.index_cast %9 : i32 to index
    %28 = vector.load %arg6[%26, %c0_13, %27] : memref<2x8x256xf32, #tpu.memory_space<vmem>>, vector<1x8x256xf32>
    tpu.vector_store %arg6[%26, %c0_13, %27], %24 {strides = array<i32>} : memref<2x8x256xf32, #tpu.memory_space<vmem>>, vector<1x8x256xf32>,
    %c1 = arith.constant 1 : index
    %c0_14 = arith.constant 0 : index
    %c0_15 = arith.constant 0 : index
    %29 = vector.load %arg2[%c1, %c0_14, %c0_15] : memref<2x4x256xf32, #tpu.memory_space<vmem>>, vector<1x4x256xf32>
    %30 = vector.shape_cast %29 : vector<1x4x256xf32> to vector<4x256xf32>
    %cst_16 = arith.constant dense<0.000000e+00> : vector<8x256xf32>
    %31 = tpu.matmul %11, %30, %cst_16 {dimension_numbers = #tpu.dot_dimension_numbers<[1], [0], [0], [1], [0, 0, 1, 1], [], []>} : vector<8x4xf32>, vector<4x256xf32>, vector<8x256xf32> -> vector<8x256xf32>
    %cst_17 = arith.constant dense<0.000000e+00> : vector<8xf32>
    %32 = vector.multi_reduction <add>, %31, %cst_17 [1] : vector<8x256xf32> to vector<8xf32>
    %33 = vector.shape_cast %32 : vector<8xf32> to vector<8x1xf32>
    %34 = arith.addf %19, %33 : vector<8x1xf32>
    %35 = arith.mulf %31, %31 : vector<8x256xf32>
    %cst_18 = arith.constant dense<0.000000e+00> : vector<8xf32>
    %36 = vector.multi_reduction <add>, %35, %cst_18 [1] : vector<8x256xf32> to vector<8xf32>
    %37 = vector.shape_cast %36 : vector<8xf32> to vector<8x1xf32>
    %38 = arith.addf %23, %37 : vector<8x1xf32>
    %39 = vector.shape_cast %31 : vector<8x256xf32> to vector<1x8x256xf32>
    %c1_i32 = arith.constant 1 : i32
    %40 = arith.addi %10, %c1_i32 : i32
    %41 = arith.index_cast %40 : i32 to index
    %c0_19 = arith.constant 0 : index
    %42 = arith.index_cast %9 : i32 to index
    %43 = vector.load %arg6[%41, %c0_19, %42] : memref<2x8x256xf32, #tpu.memory_space<vmem>>, vector<1x8x256xf32>
    tpu.vector_store %arg6[%41, %c0_19, %42], %39 {strides = array<i32>} : memref<2x8x256xf32, #tpu.memory_space<vmem>>, vector<1x8x256xf32>,
    %c0_20 = arith.constant 0 : index
    %c0_21 = arith.constant 0 : index
    %44 = vector.load %arg7[%c0_20, %c0_21] : memref<8x1xf32, #tpu.memory_space<vmem>>, vector<8x1xf32>
    %45 = arith.addf %44, %34 : vector<8x1xf32>
    %c0_22 = arith.constant 0 : index
    %c0_23 = arith.constant 0 : index
    %46 = vector.load %arg7[%c0_22, %c0_23] : memref<8x1xf32, #tpu.memory_space<vmem>>, vector<8x1xf32>
    tpu.vector_store %arg7[%c0_22, %c0_23], %45 {strides = array<i32>} : memref<8x1xf32, #tpu.memory_space<vmem>>, vector<8x1xf32>,
    %c0_24 = arith.constant 0 : index
    %c0_25 = arith.constant 0 : index
    %47 = vector.load %arg8[%c0_24, %c0_25] : memref<8x1xf32, #tpu.memory_space<vmem>>, vector<8x1xf32>
    %48 = arith.addf %47, %38 : vector<8x1xf32>
    %c0_26 = arith.constant 0 : index
    %c0_27 = arith.constant 0 : index
    %49 = vector.load %arg8[%c0_26, %c0_27] : memref<8x1xf32, #tpu.memory_space<vmem>>, vector<8x1xf32>
    tpu.vector_store %arg8[%c0_26, %c0_27], %48 {strides = array<i32>} : memref<8x1xf32, #tpu.memory_space<vmem>>, vector<8x1xf32>,
    %50 = arith.extui %5 : i1 to i32
    %c0_i32_28 = arith.constant 0 : i32
    %51 = arith.cmpi ne, %50, %c0_i32_28 : i32
    scf.if %51 {
      %c0_29 = arith.constant 0 : index
      %c0_30 = arith.constant 0 : index
      %52 = vector.load %arg7[%c0_29, %c0_30] : memref<8x1xf32, #tpu.memory_space<vmem>>, vector<8x1xf32>
      %cst_31 = arith.constant 0.001953125 : f32
      %53 = vector.broadcast %cst_31 : f32 to vector<8x1xf32>
      %54 = arith.mulf %52, %53 : vector<8x1xf32>
      %c0_32 = arith.constant 0 : index
      %c0_33 = arith.constant 0 : index
      %55 = vector.load %arg8[%c0_32, %c0_33] : memref<8x1xf32, #tpu.memory_space<vmem>>, vector<8x1xf32>
      %cst_34 = arith.constant 0.001953125 : f32
      %56 = vector.broadcast %cst_34 : f32 to vector<8x1xf32>
      %57 = arith.mulf %55, %56 : vector<8x1xf32>
      %58 = arith.mulf %54, %54 : vector<8x1xf32>
      %59 = arith.subf %57, %58 : vector<8x1xf32>
      %cst_35 = arith.constant 0.000000e+00 : f32
      %60 = vector.broadcast %cst_35 : f32 to vector<8x1xf32>
      %61 = arith.maximumf %59, %60 : vector<8x1xf32>
      %c0_36 = arith.constant 0 : index
      %c0_37 = arith.constant 0 : index
      %62 = vector.load %arg4[%c0_36, %c0_37] : memref<8x1xf32, #tpu.memory_space<vmem>>, vector<8x1xf32>
      %cst_38 = arith.constant 9.99999974E-6 : f32
      %63 = vector.broadcast %cst_38 : f32 to vector<8x1xf32>
      %64 = arith.addf %61, %63 : vector<8x1xf32>
      %65 = math.rsqrt %64 : vector<8x1xf32>
      %66 = arith.mulf %62, %65 : vector<8x1xf32>
      %c0_39 = arith.constant 0 : index
      %c0_40 = arith.constant 0 : index
      %67 = vector.load %arg5[%c0_39, %c0_40] : memref<8x1xf32, #tpu.memory_space<vmem>>, vector<8x1xf32>
      %68 = arith.mulf %54, %66 : vector<8x1xf32>
      %69 = arith.subf %67, %68 : vector<8x1xf32>
      %c0_i32_41 = arith.constant 0 : i32
      %c2_i32_42 = arith.constant 2 : i32
      %70 = arith.addi %c0_i32_41, %c2_i32_42 : i32
      %c1_i32_43 = arith.constant 1 : i32
      scf.for %arg9 = %c0_i32_41 to %70 step %c1_i32_43  : i32 {
        %c1_i32_45 = arith.constant 1 : i32
        %71 = arith.muli %arg9, %c1_i32_45 : i32
        %c0_i32_46 = arith.constant 0 : i32
        %72 = arith.addi %c0_i32_46, %71 : i32
        %73 = arith.index_cast %72 : i32 to index
        %c0_47 = arith.constant 0 : index
        %c0_48 = arith.constant 0 : index
        %74 = vector.load %arg6[%73, %c0_47, %c0_48] : memref<2x8x256xf32, #tpu.memory_space<vmem>>, vector<1x8x256xf32>
        %75 = vector.shape_cast %66 : vector<8x1xf32> to vector<1x8x1xf32>
        %76 = vector.broadcast %75 : vector<1x8x1xf32> to vector<1x8x256xf32>
        %77 = arith.mulf %74, %76 : vector<1x8x256xf32>
        %78 = vector.shape_cast %69 : vector<8x1xf32> to vector<1x8x1xf32>
        %79 = vector.broadcast %78 : vector<1x8x1xf32> to vector<1x8x256xf32>
        %80 = arith.addf %77, %79 : vector<1x8x256xf32>
        %cst_49 = arith.constant 0.000000e+00 : f32
        %81 = vector.broadcast %cst_49 : f32 to vector<1x8x256xf32>
        %82 = arith.maximumf %80, %81 : vector<1x8x256xf32>
        %83 = arith.index_cast %72 : i32 to index
        %c0_50 = arith.constant 0 : index
        %c0_51 = arith.constant 0 : index
        %84 = vector.load %arg6[%83, %c0_50, %c0_51] : memref<2x8x256xf32, #tpu.memory_space<vmem>>, vector<1x8x256xf32>
        tpu.vector_store %arg6[%83, %c0_50, %c0_51], %82 {strides = array<i32>} : memref<2x8x256xf32, #tpu.memory_space<vmem>>, vector<1x8x256xf32>,
      }
      %c2_i32_44 = arith.constant 2 : i32
    } else {
    }
    return
  }
  func.func @transform_0(%arg0: i32, %arg1: i32) -> (i32, i32, i32) {
    %c0_i32 = arith.constant 0 : i32
    %c0_i32_0 = arith.constant 0 : i32
    return %arg0, %c0_i32, %arg1 : i32, i32, i32
  }
  func.func @transform_1(%arg0: i32, %arg1: i32) -> (i32, i32) {
    %c0_i32 = arith.constant 0 : i32
    %c0_i32_0 = arith.constant 0 : i32
    %c0_i32_1 = arith.constant 0 : i32
    return %c0_i32, %c0_i32_0 : i32, i32
  }
  func.func @transform_2(%arg0: i32, %arg1: i32) -> (i32, i32) {
    %c0_i32 = arith.constant 0 : i32
    %c0_i32_0 = arith.constant 0 : i32
    %c0_i32_1 = arith.constant 0 : i32
    return %c0_i32, %c0_i32_0 : i32, i32
  }
  func.func @transform_3(%arg0: i32, %arg1: i32) -> (i32, i32) {
    %c0_i32 = arith.constant 0 : i32
    %c0_i32_0 = arith.constant 0 : i32
    %c0_i32_1 = arith.constant 0 : i32
    return %c0_i32, %c0_i32_0 : i32, i32
  }
  func.func @transform_4(%arg0: i32, %arg1: i32) -> (i32, i32, i32) {
    %c0_i32 = arith.constant 0 : i32
    %c0_i32_0 = arith.constant 0 : i32
    %c0_i32_1 = arith.constant 0 : i32
    %c0_i32_2 = arith.constant 0 : i32
    return %c0_i32, %c0_i32_0, %c0_i32_1 : i32, i32, i32
  }
}

</mosaic_0001>

<bundles_post_ra>
// kernel: tpu_custom_call.1
= control target key start
LH: loop header
LB: loop body
LE: loop exit
PB: predicated region body
PF: predicated region fallthrough
CT: control target
= control target key end

     0   :  { %9 = vsyncpa [#allocation5], 0  ;;  %vm39_vm0 = vcmask 1043456   ;;  %vm35_vm1 = vcmask 31744   ;;  %vm24_vm2 = vcmask 7168   ;;  %v322_v19 = vmov 0.0   ;;  %s370_s0 = inlined_call_operand.vmem [shape: f32[2,4,256], index: 0, kind: input, shape index: {}]   ;;  %s371_s1 = inlined_call_operand.vmem [shape: f32[8,4], index: 1, kind: input, shape index: {}]   ;;  %s372_s2 = inlined_call_operand.vmem [shape: f32[8,1], index: 2, kind: input, shape index: {}]   ;;  %s373_s3 = inlined_call_operand.vmem [shape: f32[8,1], index: 3, kind: input, shape index: {}]   ;;  %s374_s4 = inlined_call_operand.hbm [shape: f32[2,8,256], index: 4, kind: output, shape index: {}]  }
   0x1   :  { %v30_v0 = vld [vmem:[%s370_s0] sm:$0xff]  ;;  %v264_v1 = vld [vmem:[%s370_s0 + $0x8] sm:$0xff]  ;;  %25 = vst.msk [vmem:[#allocation2] sm:$0xff] %vm24_vm2, %v322_v19  ;;  %s318_s23 = smov 0  }
   0x2   :  { %32 = vst [vmem:[#allocation1] ss:$2 sm:$0xff] %v30_v0  ;;  %v29_v2 = vld [vmem:[%s371_s1] sm:$0xff] }
   0x3   :  { %26 = vst.msk [vmem:[#allocation3] sm:$0xff] %vm24_vm2, %v322_v19  ;;  %v185_v43 = vld [vmem:[%s372_s2] sm:$0xff] }
   0x4   :  { %v198_v47 = vld [vmem:[%s373_s3] sm:$0xff] }
   0x8   :  { %v169_v23 = vld [vmem:[#allocation2] sm:$0xff] }
   0x9   :  { %v33_v3 = vld.sshfl [vmem:[#allocation1] sm:$0xff pattern:$0x75316420]  ;;  %v34_v4 = vld.sshfl [vmem:[#allocation1 + $0x8] sm:$0xff pattern:$0x75316420] }
   0xa   :  { %260 = vmatpush.msk.msra.mxu0 %vm39_vm0, %v33_v3  ;;  %262 = vmatpush.msk.msra.mxu1 %vm39_vm0, %v34_v4  ;;  %105 = vst [vmem:[#allocation1] ss:$2 sm:$0xff] %v264_v1  ;;  %v173_v26 = vld [vmem:[#allocation3] sm:$0xff] }
   0xb   :  { %261 = vmatmul.msk.f32.vlgmr.msra.gmra.mxu0 %vm35_vm1, %v29_v2  ;;  %263 = vmatmul.msk.f32.vlgmr.msra.gmra.mxu1 %vm35_vm1, %v29_v2 }
  0x11   :  { %v106_v5 = vld.sshfl [vmem:[#allocation1] sm:$0xff pattern:$0x75316420]  ;;  %v107_v6 = vld.sshfl [vmem:[#allocation1 + $0x8] sm:$0xff pattern:$0x75316420] }
  0x12   :  { %265 = vmatpush.msk.msra.mxu2 %vm39_vm0, %v106_v5  ;;  %267 = vmatpush.msk.msra.mxu3 %vm39_vm0, %v107_v6 }
  0x13   :  { %266 = vmatmul.msk.f32.vlgmr.msra.gmra.mxu2 %vm35_vm1, %v29_v2  ;;  %268 = vmatmul.msk.f32.vlgmr.msra.gmra.mxu3 %vm35_vm1, %v29_v2 }
  0x88   :  { %v61_v7 = vpop.f32.mrf.mxu0  ;;  %v81_v8 = vpop.f32.mrf.mxu1 }
  0x89   :  { %v88_v9 = vmul.f32 %v61_v7, %v61_v7  ;;  %100 = vst [vmem:[#allocation4] sm:$0xff] %v61_v7  ;;  %v89_v10 = vmul.f32 %v81_v8, %v81_v8  ;;  %v84_v11 = vadd.f32 %v81_v8, %v61_v7 }
  0x8a   :  { %101 = vst [vmem:[#allocation4 + $0x8] sm:$0xff] %v81_v8 }
  0x8b   :  { %85 = vadd.xlane.f32.xlu0 %v84_v11  ;;  %v90_v12 = vadd.f32 %v89_v10, %v88_v9 }
  0x8d   :  { %91 = vadd.xlane.f32.xlu1 %v90_v12 }
  0x96   :  { %v129_v13 = vpop.f32.mrf.mxu2  ;;  %v149_v14 = vpop.f32.mrf.mxu3 }
  0x97   :  { %v156_v15 = vmul.f32 %v129_v13, %v129_v13  ;;  %167 = vst [vmem:[#allocation4 + $0x10] sm:$0xff] %v129_v13  ;;  %v157_v16 = vmul.f32 %v149_v14, %v149_v14  ;;  %v152_v17 = vadd.f32 %v149_v14, %v129_v13 }
  0x98   :  { %168 = vst [vmem:[#allocation4 + $0x18] sm:$0xff] %v149_v14 }
  0x99   :  { %153 = vadd.xlane.f32.xlu0 %v152_v17  ;;  %v158_v18 = vadd.f32 %v157_v16, %v156_v15 }
  0x9b   :  { %159 = vadd.xlane.f32.xlu1 %v158_v18 }
  0xfe   :  { %v86_v20 = vpop.xlane.xlu0 %85 }
 0x100   :  { %v92_v21 = vpop.xlane.xlu1 %91 }
 0x10c   :  { %v154_v22 = vpop.xlane.xlu0 %153 }
 0x10d   :  { %v155_v24 = vadd.f32 %v154_v22, %v86_v20 }
 0x10e   :  { %v160_v25 = vpop.xlane.xlu1 %159 }
 0x10f   :  { %v170_v27 = vadd.f32 %v169_v23, %v155_v24  ;;  %v161_v28 = vadd.f32 %v160_v25, %v92_v21 }
 0x111   :  { %172 = vst.msk [vmem:[#allocation2] sm:$0xff] %vm24_vm2, %v170_v27  ;;  %v174_v29 = vadd.f32 %v173_v26, %v161_v28 }
 0x113   :  { %175 = vst.msk [vmem:[#allocation3] sm:$0xff] %vm24_vm2, %v174_v29 }
 0x118   :  { %v178_v30 = vld [vmem:[#allocation2] sm:$0xff] }
 0x119   :  { %v179_v31 = vmul.f32 0.001953125, %v178_v30 }
 0x11a   :  { %v180_v32 = vld [vmem:[#allocation3] sm:$0xff] }
 0x11b   :  { %v182_v33 = vmul.f32 %v179_v31, %v179_v31  ;;  %v181_v34 = vmul.f32 0.001953125, %v180_v32 }
 0x11d   :  { %v183_v35 = vsub.f32 %v181_v34, %v182_v33 }
 0x11f   :  { %v184_v36 = vmax.f32 %v183_v35, 0.0 }
 0x121   :  { %v186_v37 = vadd.f32 1e-05, %v184_v36 }
 0x123   :  { %285 = vrsqrt.f32 %v186_v37  ;;  %vm193_vm4 = vweird.f32 %v186_v37 }
 0x129   :  { %v286_v38 = vpop.eup %285 }
 0x12a   :  { %v188_v39 = vmul.f32 %v286_v38, %v186_v37  ;;  %vm194_vm3 = vweird.f32 %v286_v38 }
 0x12b   :  { %vm195_vm5 = vmor %vm193_vm4, %vm194_vm3 }
 0x12c   :  { %v189_v40 = vmul.f32 %v286_v38, %v188_v39 }
 0x12e   :  { %v190_v41 = vmul.f32 0.5, %v189_v40 }
 0x130   :  { %v191_v42 = vsub.f32 1.5, %v190_v41 }
 0x132   :  { %v192_v44 = vmul.f32 %v286_v38, %v191_v42 }
 0x134   :  { %v196_v45 = vsel %vm195_vm5, %v286_v38, %v192_v44 }
 0x135   :  { %v197_v46 = vmul.f32 %v196_v45, %v185_v43 }
 0x137   :  { %v199_v48 = vmul.f32 %v197_v46, %v179_v31 }
 0x139   :  { %v200_v49 = vsub.f32 %v198_v47, %v199_v48 }
 0x13a LB: > { %v323_v50 = vmov 0   ;;  %s271_s2 = sshll.u32 %s320_s23, 4  ;;  %s206_s23 = sadd.s32 1, %s320_s23   ;;  %s320_s23 = sphi %s318_s23, %s206_s23  }
 0x13b   : > { %287 = vset.pattern.permute.xlu0 %v323_v50  ;;  %s209_s24 = scalar_lea.vmem [#allocation4], %s271_s2  ;;  %p203_p0 = scmp.ge.s32.totalorder %s206_s23, 2  }
 0x13c   : > { %214 = vperm.xlu0 %287, %v197_v46   ;;  %v210_v52 = vld [vmem:[%s209_s24] sm:$0xff]  ;;  %v211_v53 = vld [vmem:[%s209_s24 + $0x8] sm:$0xff]  ;;  %s236_s26 = sshll.u32 (%p203_p0), %s374_s4, 4  ;;  %s324_s27 = smov (%p203_p0), [#allocation4]   ;;  %s237_s26 = int_to_ptr.hbm [resolvable:$true] %s236_s26 }
 0x13d   :  { %s234_s28 = sshll.u32 (%p203_p0), %s324_s27, 4  ;;  %s325_s29 = smov (%p203_p0), 256   ;;  %s235_s28 = int_to_ptr.vmem [resolvable:$true] %s234_s28 }
 0x13e   :  { %s326_s30 = smov (%p203_p0), 16  }
 0x144   : > { %221 = vperm.xlu0 %287, %v200_v49  }
 0x1ae   : > { %v215_v51 = vpop.permute.xlu0 %214 }
 0x1af   : > { %v217_v54 = vmul.f32 %v215_v51, %v210_v52  ;;  %v218_v55 = vmul.f32 %v215_v51, %v211_v53 }
 0x1b6   : > { %v222_v56 = vpop.permute.xlu0 %221 }
 0x1b7   : > { %v224_v57 = vadd.f32 %v222_v56, %v217_v54  ;;  %v225_v58 = vadd.f32 %v222_v56, %v218_v55 }
 0x1b8   :  { %205 = sbr.rel (!%p203_p0) target bundleno = 314 (0x13a), region = 55 }
 0x1b9   : > { %v226_v59 = vmax.f32 %v224_v57, 0.0  ;;  %v227_v60 = vmax.f32 %v225_v58, 0.0 }
 0x1bb   : > { %228 = vst [vmem:[%s209_s24] sm:$0xff] %v226_v59 }
 0x1bc   : > { %229 = vst [vmem:[%s209_s24 + $0x8] sm:$0xff] %v227_v60 }
 0x1bd   :  { %242 = dma.vmem_to_hbm [thread:$0]  %s235_s28, 512, %s237_s26, [#allocation5], %s325_s29, %s325_s29, %s326_s30  }
 0x1be   :  { %316 = dma.done.wait [#allocation5], 512  }
 0x1bf   :  { %317 = vsyncadd [#allocation5], 4294966784 }
 0x1c0   :  { %247 = vsyncpa [#allocation5], 1 }

</bundles_post_ra>
